<compile_context>
chip_gen: v7x
topology: tpu7x:2x2x1
jax: 0.10.0
libtpu: 0.0.40
codegen_flags: <defaults>
</compile_context>

<pallas_src>
import functools

import jax
import jax.numpy as jnp
from jax.experimental import pallas as pl
from jax.experimental.pallas import tpu as pltpu


# Per-operand per-block byte cap: 4 buffers x double-buffering ~= 16 MiB worst case,
# comfortably inside every generation's scoped-VMEM default (incl. v7x's 64 MiB chip).
_MAX_BLOCK_BYTES = 2 * 1024 * 1024


def _add3_kernel(a_ref, b_ref, c_ref, o_ref):
    # Elementwise hot path: two VPU adds, association pinned to (a + b) + c.
    o_ref[...] = (a_ref[...] + b_ref[...]) + c_ref[...]


def _round_down(x, m):
    return (x // m) * m


def add3(x556, x570, x578, *, donate_first_input=False):
    assert x556.shape == x570.shape == x578.shape
    assert x556.dtype == x570.dtype == x578.dtype
    orig_shape = x556.shape
    dtype = x556.dtype
    itemsize = jnp.dtype(dtype).itemsize

    total = 1
    for d in orig_shape:
        total *= d

    # ---- choose a 2-D view and a lane-dense tiling -------------------------------
    if total % (8 * 128) == 0:
        # Fast path: (8, total/8) view -> every block is fully vreg-packed (8 sublanes
        # x 128-lane multiples), all loads/stores unmasked. [1,7,7,1024] -> (8, 6272).
        rows, cols = 8, total // 8
        max_tile_cols = max(128, _round_down(_MAX_BLOCK_BYTES // (rows * itemsize), 128))
        if cols <= max_tile_cols:
            grid = ()
            spec = pl.BlockSpec((rows, cols), lambda: (0, 0))
        else:
            # Large inputs: tile the lane dim in 128-multiples instead of one huge
            # VMEM-busting block; final partial block (if any) is masked by Pallas.
            tile_cols = max_tile_cols
            grid = (pl.cdiv(cols, tile_cols),)
            spec = pl.BlockSpec((rows, tile_cols), lambda i: (0, i))
    else:
        # Fallback: keep the original last dim as the lane dim and tile sublanes.
        cols = orig_shape[-1] if orig_shape else 1
        rows = total // cols
        # TODO(synk): cols not a multiple of 128 => masked vst.msk stores (correct, slower).
        max_tile_rows = max(8, _round_down(_MAX_BLOCK_BYTES // (cols * itemsize), 8))
        if rows <= max_tile_rows:
            grid = ()
            spec = pl.BlockSpec((rows, cols), lambda: (0, 0))
        else:
            tile_rows = max_tile_rows
            grid = (pl.cdiv(rows, tile_rows),)
            spec = pl.BlockSpec((tile_rows, cols), lambda i: (i, 0))

    a2 = x556.reshape(rows, cols)
    b2 = x570.reshape(rows, cols)
    c2 = x578.reshape(rows, cols)

    cost = pl.CostEstimate(
        flops=2 * total,                        # two adds per element
        transcendentals=0,
        bytes_accessed=4 * total * itemsize,    # 3 inputs read + 1 output written
    )

    kwargs = {}
    if grid:
        # Independent output blocks -> megacore-shardable on multi-TC chips (v7x).
        kwargs["compiler_params"] = pltpu.CompilerParams(
            dimension_semantics=("parallel",))
    if donate_first_input:
        # Reuse x556's HBM buffer for the output. Only enable when the caller can
        # actually donate x556 (e.g. jax.jit(..., donate_argnums=(0,))).
        kwargs["input_output_aliases"] = {0: 0}

    out = pl.pallas_call(
        _add3_kernel,
        out_shape=jax.ShapeDtypeStruct((rows, cols), dtype),
        grid=grid,
        in_specs=[spec, spec, spec],
        out_specs=spec,
        cost_estimate=cost,
        **kwargs,
    )(a2, b2, c2)
    return out.reshape(orig_shape)


if __name__ == "__main__":
    key = jax.random.PRNGKey(0)
    k1, k2, k3 = jax.random.split(key, 3)
    shape = (1, 7, 7, 1024)  # matches torch.Size([1, 7, 7, 1024])
    x556 = jax.random.normal(k1, shape, dtype=jnp.float32)
    x570 = jax.random.normal(k2, shape, dtype=jnp.float32)
    x578 = jax.random.normal(k3, shape, dtype=jnp.float32)

    # Reference first (same (a + b) + c association), before any buffer donation.
    ref = jax.block_until_ready((x556 + x570) + x578)

    # Default path (no donation).
    out = jax.block_until_ready(add3(x556, x570, x578))
    assert out.shape == shape and out.dtype == jnp.float32
    assert jnp.allclose(out, ref, rtol=1e-6, atol=1e-6)

    # Donated path: output reuses x556's HBM buffer (x556 is not used afterwards).
    add3_donated = jax.jit(
        functools.partial(add3, donate_first_input=True), donate_argnums=(0,))
    out2 = jax.block_until_ready(add3_donated(x556, x570, x578))
    assert jnp.allclose(out2, ref, rtol=1e-6, atol=1e-6)

    print("KERNEL_OK")
</pallas_src>

<mosaic_0001>
module attributes {stable_mosaic.version = 11 : i64} {
  func.func @_add3_kernel(%arg0: memref<8x6272xf32, #tpu.memory_space<vmem>>, %arg1: memref<8x6272xf32, #tpu.memory_space<vmem>>, %arg2: memref<8x6272xf32, #tpu.memory_space<vmem>>, %arg3: memref<8x6272xf32, #tpu.memory_space<vmem>>) attributes {dimension_semantics = [], scalar_prefetch = 0 : i64, scratch_operands = 0 : i64, tpu.core_type = #tpu.core_type<tc>} {
    %c0 = arith.constant 0 : index
    %c0_0 = arith.constant 0 : index
    %0 = vector.load %arg0[%c0, %c0_0] : memref<8x6272xf32, #tpu.memory_space<vmem>>, vector<8x6272xf32>
    %c0_1 = arith.constant 0 : index
    %c0_2 = arith.constant 0 : index
    %1 = vector.load %arg1[%c0_1, %c0_2] : memref<8x6272xf32, #tpu.memory_space<vmem>>, vector<8x6272xf32>
    %2 = arith.addf %0, %1 : vector<8x6272xf32>
    %c0_3 = arith.constant 0 : index
    %c0_4 = arith.constant 0 : index
    %3 = vector.load %arg2[%c0_3, %c0_4] : memref<8x6272xf32, #tpu.memory_space<vmem>>, vector<8x6272xf32>
    %4 = arith.addf %2, %3 : vector<8x6272xf32>
    %c0_5 = arith.constant 0 : index
    %c0_6 = arith.constant 0 : index
    %5 = vector.load %arg3[%c0_5, %c0_6] : memref<8x6272xf32, #tpu.memory_space<vmem>>, vector<8x6272xf32>
    tpu.vector_store %arg3[%c0_5, %c0_6], %4 {strides = array<i32>} : memref<8x6272xf32, #tpu.memory_space<vmem>>, vector<8x6272xf32>,
    return
  }
}

</mosaic_0001>

<bundles_post_ra>
// kernel: tpu_custom_call.1
= control target key start
LH: loop header
LB: loop body
LE: loop exit
PB: predicated region body
PF: predicated region fallthrough
CT: control target
= control target key end

     0   :  { %8 = vsyncpa [#allocation3], 0  ;;  %s530_s0 = inlined_call_operand.hbm [shape: f32[8,6272], index: 0, kind: input, shape index: {}]   ;;  %s531_s1 = inlined_call_operand.hbm [shape: f32[8,6272], index: 1, kind: input, shape index: {}]   ;;  %s532_s2 = inlined_call_operand.hbm [shape: f32[8,6272], index: 2, kind: input, shape index: {}]   ;;  %s533_s3 = inlined_call_operand.hbm [shape: f32[8,6272], index: 3, kind: output, shape index: {}]  }
   0x1   :  { %9 = vsyncpa [#allocation6], 0 }
   0x2   :  { %10 = vsyncpa [#allocation4], 0  ;;  %s458_s12 = smov [#allocation5]   ;;  %s459_s14 = smov [#allocation2]  }
   0x3   :  { %s27_s13 = sshll.u32 %s458_s12, 4  ;;  %s17_s15 = sshll.u32 %s459_s14, 4  ;;  %s28_s13 = int_to_ptr.vmem [resolvable:$true] %s27_s13  ;;  %s18_s15 = int_to_ptr.vmem [resolvable:$true] %s17_s15 }
   0x4   :  { %s364_s18 = scalar_lea.hbm %s531_s1, 6272 }
   0x5   :  { %p365_p0 = scmp.ne.s32.totalorder %s531_s1, %s364_s18  ;;  %p368_p1 = scmp.lt.u32.totalorder %s364_s18, %s531_s1 }
   0x7   :  { %p370_p2 = pnand %p368_p1, %p365_p0 }
   0x9   :  { %373 = shalt.err (!%p370_p2)
}
   0xa   :  { %s374_s23 = scalar_lea.vmem %s28_s13, 6272  ;;  %p379_p4 = scmp.lt.s32.totalorder %s28_s13, %s28_s13 }
   0xb   :  { %p375_p3 = scmp.ne.s32.totalorder %s28_s13, %s374_s23  ;;  %p380_p5 = scmp.lt.s32.totalorder %s374_s23, %s374_s23 }
   0xd   :  { %p381_p6 = por %p380_p5, %p379_p4 }
   0xf   :  { %p382_p7 = pnand %p381_p6, %p375_p3 }
  0x11   :  { %385 = shalt.err (!%p382_p7)
}
  0x12   :  { %30 = dma.hbm_to_vmem [thread:$0]  %s531_s1, 6272, %s28_s13, [#allocation6]  }
  0x13   :  { %s386_s28 = scalar_lea.hbm %s530_s0, 6272 }
  0x14   :  { %p387_p8 = scmp.ne.s32.totalorder %s530_s0, %s386_s28  ;;  %p390_p9 = scmp.lt.u32.totalorder %s386_s28, %s530_s0 }
  0x16   :  { %p392_p10 = pnand %p390_p9, %p387_p8 }
  0x18   :  { %395 = shalt.err (!%p392_p10)
}
  0x19   :  { %s396_s6 = scalar_lea.vmem %s18_s15, 6272  ;;  %p401_p12 = scmp.lt.s32.totalorder %s18_s15, %s18_s15 }
  0x1a   :  { %p397_p11 = scmp.ne.s32.totalorder %s18_s15, %s396_s6  ;;  %p402_p13 = scmp.lt.s32.totalorder %s396_s6, %s396_s6 }
  0x1c   :  { %p403_p0 = por %p402_p13, %p401_p12 }
  0x1e   :  { %p404_p1 = pnand %p403_p0, %p397_p11 }
  0x20   :  { %407 = shalt.err (!%p404_p1)
}
  0x21   :  { %20 = dma.hbm_to_vmem [thread:$0]  %s530_s0, 6272, %s18_s15, [#allocation3]  }
  0x22   :  { %s460_s8 = smov [#allocation7]   ;;  %s408_s12 = scalar_lea.hbm %s532_s2, 6272 }
  0x23   :  { %s37_s9 = sshll.u32 %s460_s8, 4  ;;  %p409_p2 = scmp.ne.s32.totalorder %s532_s2, %s408_s12  ;;  %s38_s9 = int_to_ptr.vmem [resolvable:$true] %s37_s9 }
  0x24   :  { %p412_p3 = scmp.lt.u32.totalorder %s408_s12, %s532_s2 }
  0x26   :  { %p414_p4 = pnand %p412_p3, %p409_p2 }
  0x28   :  { %417 = shalt.err (!%p414_p4)
}
  0x29   :  { %s418_s18 = scalar_lea.vmem %s38_s9, 6272  ;;  %p423_p6 = scmp.lt.s32.totalorder %s38_s9, %s38_s9 }
  0x2a   :  { %p419_p5 = scmp.ne.s32.totalorder %s38_s9, %s418_s18  ;;  %p424_p7 = scmp.lt.s32.totalorder %s418_s18, %s418_s18 }
  0x2c   :  { %p425_p8 = por %p424_p7, %p423_p6 }
  0x2e   :  { %p426_p9 = pnand %p425_p8, %p419_p5 }
  0x30   :  { %429 = shalt.err (!%p426_p9)
}
  0x31   :  { %40 = dma.hbm_to_vmem [thread:$0]  %s532_s2, 6272, %s38_s9, [#allocation6]  }
  0x32   :  { %452 = dma.done.wait [#allocation3], 6272  }
  0x33   :  { %453 = vsyncadd [#allocation3], 4294961024 }
  0x34   :  { %454 = dma.done.wait [#allocation6], 12544  }
  0x35   :  { %455 = vsyncadd [#allocation6], 4294954752  ;;  %v50_v0 = vld [vmem:[#allocation2] sm:$0xff]  ;;  %v99_v1 = vld [vmem:[#allocation5] sm:$0xff]  ;;  %s461_s2 = smov [#allocation8]  }
  0x36   :  { %v197_v2 = vld [vmem:[#allocation7] sm:$0xff]  ;;  %v148_v3 = vadd.f32 %v99_v1, %v50_v0  ;;  %v51_v4 = vld [vmem:[#allocation2 + $0x8] sm:$0xff]  ;;  %v198_v6 = vld [vmem:[#allocation7 + $0x8] sm:$0xff]  ;;  %s350_s19 = sshll.u32 %s461_s2, 4  ;;  %s351_s19 = int_to_ptr.vmem [resolvable:$true] %s350_s19 }
  0x37   :  { %v100_v5 = vld [vmem:[#allocation5 + $0x8] sm:$0xff]  ;;  %v101_v9 = vld [vmem:[#allocation5 + $0x10] sm:$0xff]  ;;  %v199_v10 = vld [vmem:[#allocation7 + $0x10] sm:$0xff]  ;;  %s430_s20 = scalar_lea.vmem %s351_s19, 6272  ;;  %p435_p11 = scmp.lt.s32.totalorder %s351_s19, %s351_s19 }
  0x38   :  { %v149_v7 = vadd.f32 %v100_v5, %v51_v4  ;;  %v52_v8 = vld [vmem:[#allocation2 + $0x10] sm:$0xff]  ;;  %v246_v11 = vadd.f32 %v197_v2, %v148_v3  ;;  %v53_v13 = vld [vmem:[#allocation2 + $0x18] sm:$0xff]  ;;  %v102_v14 = vld [vmem:[#allocation5 + $0x18] sm:$0xff]  ;;  %p431_p10 = scmp.ne.s32.totalorder %s351_s19, %s430_s20  ;;  %p436_p12 = scmp.lt.s32.totalorder %s430_s20, %s430_s20 }
  0x39   :  { %v150_v12 = vadd.f32 %v101_v9, %v52_v8  ;;  %v200_v15 = vld [vmem:[#allocation7 + $0x18] sm:$0xff]  ;;  %v151_v17 = vadd.f32 %v102_v14, %v53_v13  ;;  %v54_v18 = vld [vmem:[#allocation2 + $0x20] sm:$0xff]  ;;  %v201_v20 = vld [vmem:[#allocation7 + $0x20] sm:$0xff] }
  0x3a   :  { %v247_v16 = vadd.f32 %v198_v6, %v149_v7  ;;  %v103_v19 = vld [vmem:[#allocation5 + $0x20] sm:$0xff]  ;;  %295 = vst [vmem:[#allocation8] sm:$0xff] %v246_v11  ;;  %v104_v24 = vld [vmem:[#allocation5 + $0x28] sm:$0xff]  ;;  %v202_v25 = vld [vmem:[#allocation7 + $0x28] sm:$0xff]  ;;  %p437_p13 = por %p436_p12, %p435_p11 }
  0x3b   :  { %v248_v21 = vadd.f32 %v199_v10, %v150_v12  ;;  %v152_v22 = vadd.f32 %v103_v19, %v54_v18  ;;  %v55_v23 = vld [vmem:[#allocation2 + $0x28] sm:$0xff]  ;;  %v249_v26 = vadd.f32 %v200_v15, %v151_v17  ;;  %v56_v28 = vld [vmem:[#allocation2 + $0x30] sm:$0xff]  ;;  %v105_v29 = vld [vmem:[#allocation5 + $0x30] sm:$0xff] }
  0x3c   :  { %296 = vst [vmem:[#allocation8 + $0x8] sm:$0xff] %v247_v16  ;;  %v153_v27 = vadd.f32 %v104_v24, %v55_v23  ;;  %v203_v30 = vld [vmem:[#allocation7 + $0x30] sm:$0xff]  ;;  %v154_v32 = vadd.f32 %v105_v29, %v56_v28  ;;  %v57_v33 = vld [vmem:[#allocation2 + $0x38] sm:$0xff]  ;;  %v204_v35 = vld [vmem:[#allocation7 + $0x38] sm:$0xff]  ;;  %p438_p0 = pnand %p437_p13, %p431_p10 }
  0x3d   :  { %297 = vst [vmem:[#allocation8 + $0x10] sm:$0xff] %v248_v21  ;;  %v250_v31 = vadd.f32 %v201_v20, %v152_v22  ;;  %v106_v34 = vld [vmem:[#allocation5 + $0x38] sm:$0xff]  ;;  %298 = vst [vmem:[#allocation8 + $0x18] sm:$0xff] %v249_v26  ;;  %v107_v39 = vld [vmem:[#allocation5 + $0x40] sm:$0xff] }
  0x3e   :  { %v251_v36 = vadd.f32 %v202_v25, %v153_v27  ;;  %v155_v37 = vadd.f32 %v106_v34, %v57_v33  ;;  %v58_v38 = vld [vmem:[#allocation2 + $0x40] sm:$0xff]  ;;  %v205_v40 = vld [vmem:[#allocation7 + $0x40] sm:$0xff]  ;;  %v252_v41 = vadd.f32 %v203_v30, %v154_v32  ;;  %v59_v43 = vld [vmem:[#allocation2 + $0x48] sm:$0xff] }
  0x3f   :  { %299 = vst [vmem:[#allocation8 + $0x20] sm:$0xff] %v250_v31  ;;  %v156_v42 = vadd.f32 %v107_v39, %v58_v38  ;;  %v108_v44 = vld [vmem:[#allocation5 + $0x48] sm:$0xff]  ;;  %v206_v45 = vld [vmem:[#allocation7 + $0x48] sm:$0xff]  ;;  %v207_v50 = vld [vmem:[#allocation7 + $0x50] sm:$0xff] }
  0x40   :  { %300 = vst [vmem:[#allocation8 + $0x28] sm:$0xff] %v251_v36  ;;  %v253_v46 = vadd.f32 %v204_v35, %v155_v37  ;;  %v157_v47 = vadd.f32 %v108_v44, %v59_v43  ;;  %v60_v48 = vld [vmem:[#allocation2 + $0x50] sm:$0xff]  ;;  %v109_v49 = vld [vmem:[#allocation5 + $0x50] sm:$0xff]  ;;  %301 = vst [vmem:[#allocation8 + $0x30] sm:$0xff] %v252_v41 }
  0x41   :  { %v254_v51 = vadd.f32 %v205_v40, %v156_v42  ;;  %v158_v52 = vadd.f32 %v109_v49, %v60_v48  ;;  %v61_v53 = vld [vmem:[#allocation2 + $0x58] sm:$0xff]  ;;  %v110_v54 = vld [vmem:[#allocation5 + $0x58] sm:$0xff]  ;;  %v208_v55 = vld [vmem:[#allocation7 + $0x58] sm:$0xff] }
  0x42   :  { %302 = vst [vmem:[#allocation8 + $0x38] sm:$0xff] %v253_v46  ;;  %v255_v56 = vadd.f32 %v206_v45, %v157_v47  ;;  %v159_v57 = vadd.f32 %v110_v54, %v61_v53  ;;  %v62_v58 = vld [vmem:[#allocation2 + $0x60] sm:$0xff]  ;;  %v111_v59 = vld [vmem:[#allocation5 + $0x60] sm:$0xff]  ;;  %v209_v60 = vld [vmem:[#allocation7 + $0x60] sm:$0xff] }
  0x43   :  { %303 = vst [vmem:[#allocation8 + $0x40] sm:$0xff] %v254_v51  ;;  %v256_v61 = vadd.f32 %v207_v50, %v158_v52  ;;  %v160_v62 = vadd.f32 %v111_v59, %v62_v58  ;;  %v63_v63 = vld [vmem:[#allocation2 + $0x68] sm:$0xff]  ;;  %v112_v0 = vld [vmem:[#allocation5 + $0x68] sm:$0xff]  ;;  %v210_v1 = vld [vmem:[#allocation7 + $0x68] sm:$0xff] }
  0x44   :  { %304 = vst [vmem:[#allocation8 + $0x48] sm:$0xff] %v255_v56  ;;  %v257_v2 = vadd.f32 %v208_v55, %v159_v57  ;;  %v161_v3 = vadd.f32 %v112_v0, %v63_v63  ;;  %v64_v4 = vld [vmem:[#allocation2 + $0x70] sm:$0xff]  ;;  %v113_v5 = vld [vmem:[#allocation5 + $0x70] sm:$0xff]  ;;  %v211_v6 = vld [vmem:[#allocation7 + $0x70] sm:$0xff] }
  0x45   :  { %305 = vst [vmem:[#allocation8 + $0x50] sm:$0xff] %v256_v61  ;;  %v258_v7 = vadd.f32 %v209_v60, %v160_v62  ;;  %v162_v8 = vadd.f32 %v113_v5, %v64_v4  ;;  %v65_v9 = vld [vmem:[#allocation2 + $0x78] sm:$0xff]  ;;  %v114_v10 = vld [vmem:[#allocation5 + $0x78] sm:$0xff]  ;;  %v212_v11 = vld [vmem:[#allocation7 + $0x78] sm:$0xff] }
  0x46   :  { %306 = vst [vmem:[#allocation8 + $0x58] sm:$0xff] %v257_v2  ;;  %v259_v12 = vadd.f32 %v210_v1, %v161_v3  ;;  %v163_v13 = vadd.f32 %v114_v10, %v65_v9  ;;  %v66_v14 = vld [vmem:[#allocation2 + $0x80] sm:$0xff]  ;;  %v115_v15 = vld [vmem:[#allocation5 + $0x80] sm:$0xff]  ;;  %v213_v16 = vld [vmem:[#allocation7 + $0x80] sm:$0xff] }
  0x47   :  { %307 = vst [vmem:[#allocation8 + $0x60] sm:$0xff] %v258_v7  ;;  %v260_v17 = vadd.f32 %v211_v6, %v162_v8  ;;  %v164_v18 = vadd.f32 %v115_v15, %v66_v14  ;;  %v67_v19 = vld [vmem:[#allocation2 + $0x88] sm:$0xff]  ;;  %v116_v20 = vld [vmem:[#allocation5 + $0x88] sm:$0xff]  ;;  %v214_v21 = vld [vmem:[#allocation7 + $0x88] sm:$0xff] }
  0x48   :  { %308 = vst [vmem:[#allocation8 + $0x68] sm:$0xff] %v259_v12  ;;  %v261_v22 = vadd.f32 %v212_v11, %v163_v13  ;;  %v165_v23 = vadd.f32 %v116_v20, %v67_v19  ;;  %v68_v24 = vld [vmem:[#allocation2 + $0x90] sm:$0xff]  ;;  %v117_v25 = vld [vmem:[#allocation5 + $0x90] sm:$0xff]  ;;  %v215_v26 = vld [vmem:[#allocation7 + $0x90] sm:$0xff] }
  0x49   :  { %309 = vst [vmem:[#allocation8 + $0x70] sm:$0xff] %v260_v17  ;;  %v262_v27 = vadd.f32 %v213_v16, %v164_v18  ;;  %v166_v28 = vadd.f32 %v117_v25, %v68_v24  ;;  %v69_v29 = vld [vmem:[#allocation2 + $0x98] sm:$0xff]  ;;  %v118_v30 = vld [vmem:[#allocation5 + $0x98] sm:$0xff]  ;;  %v216_v31 = vld [vmem:[#allocation7 + $0x98] sm:$0xff] }
  0x4a   :  { %310 = vst [vmem:[#allocation8 + $0x78] sm:$0xff] %v261_v22  ;;  %v263_v32 = vadd.f32 %v214_v21, %v165_v23  ;;  %v167_v33 = vadd.f32 %v118_v30, %v69_v29  ;;  %v70_v34 = vld [vmem:[#allocation2 + $0xa0] sm:$0xff]  ;;  %v119_v35 = vld [vmem:[#allocation5 + $0xa0] sm:$0xff]  ;;  %v217_v36 = vld [vmem:[#allocation7 + $0xa0] sm:$0xff] }
  0x4b   :  { %311 = vst [vmem:[#allocation8 + $0x80] sm:$0xff] %v262_v27  ;;  %v264_v37 = vadd.f32 %v215_v26, %v166_v28  ;;  %v168_v38 = vadd.f32 %v119_v35, %v70_v34  ;;  %v71_v39 = vld [vmem:[#allocation2 + $0xa8] sm:$0xff]  ;;  %v120_v40 = vld [vmem:[#allocation5 + $0xa8] sm:$0xff]  ;;  %v218_v41 = vld [vmem:[#allocation7 + $0xa8] sm:$0xff] }
  0x4c   :  { %312 = vst [vmem:[#allocation8 + $0x88] sm:$0xff] %v263_v32  ;;  %v265_v42 = vadd.f32 %v216_v31, %v167_v33  ;;  %v169_v43 = vadd.f32 %v120_v40, %v71_v39  ;;  %v72_v44 = vld [vmem:[#allocation2 + $0xb0] sm:$0xff]  ;;  %v121_v45 = vld [vmem:[#allocation5 + $0xb0] sm:$0xff]  ;;  %v219_v46 = vld [vmem:[#allocation7 + $0xb0] sm:$0xff] }
  0x4d   :  { %313 = vst [vmem:[#allocation8 + $0x90] sm:$0xff] %v264_v37  ;;  %v266_v47 = vadd.f32 %v217_v36, %v168_v38  ;;  %v170_v48 = vadd.f32 %v121_v45, %v72_v44  ;;  %v73_v49 = vld [vmem:[#allocation2 + $0xb8] sm:$0xff]  ;;  %v122_v50 = vld [vmem:[#allocation5 + $0xb8] sm:$0xff]  ;;  %v220_v51 = vld [vmem:[#allocation7 + $0xb8] sm:$0xff] }
  0x4e   :  { %314 = vst [vmem:[#allocation8 + $0x98] sm:$0xff] %v265_v42  ;;  %v267_v52 = vadd.f32 %v218_v41, %v169_v43  ;;  %v171_v53 = vadd.f32 %v122_v50, %v73_v49  ;;  %v74_v54 = vld [vmem:[#allocation2 + $0xc0] sm:$0xff]  ;;  %v123_v55 = vld [vmem:[#allocation5 + $0xc0] sm:$0xff]  ;;  %v221_v56 = vld [vmem:[#allocation7 + $0xc0] sm:$0xff] }
  0x4f   :  { %315 = vst [vmem:[#allocation8 + $0xa0] sm:$0xff] %v266_v47  ;;  %v268_v57 = vadd.f32 %v219_v46, %v170_v48  ;;  %v172_v58 = vadd.f32 %v123_v55, %v74_v54  ;;  %v75_v59 = vld [vmem:[#allocation2 + $0xc8] sm:$0xff]  ;;  %v124_v60 = vld [vmem:[#allocation5 + $0xc8] sm:$0xff]  ;;  %v222_v61 = vld [vmem:[#allocation7 + $0xc8] sm:$0xff] }
  0x50   :  { %316 = vst [vmem:[#allocation8 + $0xa8] sm:$0xff] %v267_v52  ;;  %v269_v62 = vadd.f32 %v220_v51, %v171_v53  ;;  %v173_v63 = vadd.f32 %v124_v60, %v75_v59  ;;  %v76_v0 = vld [vmem:[#allocation2 + $0xd0] sm:$0xff]  ;;  %v125_v1 = vld [vmem:[#allocation5 + $0xd0] sm:$0xff]  ;;  %v223_v2 = vld [vmem:[#allocation7 + $0xd0] sm:$0xff] }
  0x51   :  { %317 = vst [vmem:[#allocation8 + $0xb0] sm:$0xff] %v268_v57  ;;  %v270_v3 = vadd.f32 %v221_v56, %v172_v58  ;;  %v174_v4 = vadd.f32 %v125_v1, %v76_v0  ;;  %v77_v5 = vld [vmem:[#allocation2 + $0xd8] sm:$0xff]  ;;  %v126_v6 = vld [vmem:[#allocation5 + $0xd8] sm:$0xff]  ;;  %v224_v7 = vld [vmem:[#allocation7 + $0xd8] sm:$0xff] }
  0x52   :  { %318 = vst [vmem:[#allocation8 + $0xb8] sm:$0xff] %v269_v62  ;;  %v271_v8 = vadd.f32 %v222_v61, %v173_v63  ;;  %v175_v9 = vadd.f32 %v126_v6, %v77_v5  ;;  %v78_v10 = vld [vmem:[#allocation2 + $0xe0] sm:$0xff]  ;;  %v127_v11 = vld [vmem:[#allocation5 + $0xe0] sm:$0xff]  ;;  %v225_v12 = vld [vmem:[#allocation7 + $0xe0] sm:$0xff] }
  0x53   :  { %319 = vst [vmem:[#allocation8 + $0xc0] sm:$0xff] %v270_v3  ;;  %v272_v13 = vadd.f32 %v223_v2, %v174_v4  ;;  %v176_v14 = vadd.f32 %v127_v11, %v78_v10  ;;  %v79_v15 = vld [vmem:[#allocation2 + $0xe8] sm:$0xff]  ;;  %v128_v16 = vld [vmem:[#allocation5 + $0xe8] sm:$0xff]  ;;  %v226_v17 = vld [vmem:[#allocation7 + $0xe8] sm:$0xff] }
  0x54   :  { %320 = vst [vmem:[#allocation8 + $0xc8] sm:$0xff] %v271_v8  ;;  %v273_v18 = vadd.f32 %v224_v7, %v175_v9  ;;  %v177_v19 = vadd.f32 %v128_v16, %v79_v15  ;;  %v80_v20 = vld [vmem:[#allocation2 + $0xf0] sm:$0xff]  ;;  %v129_v21 = vld [vmem:[#allocation5 + $0xf0] sm:$0xff]  ;;  %v227_v22 = vld [vmem:[#allocation7 + $0xf0] sm:$0xff] }
  0x55   :  { %321 = vst [vmem:[#allocation8 + $0xd0] sm:$0xff] %v272_v13  ;;  %v274_v23 = vadd.f32 %v225_v12, %v176_v14  ;;  %v178_v24 = vadd.f32 %v129_v21, %v80_v20  ;;  %v81_v25 = vld [vmem:[#allocation2 + $0xf8] sm:$0xff]  ;;  %v130_v26 = vld [vmem:[#allocation5 + $0xf8] sm:$0xff]  ;;  %v228_v27 = vld [vmem:[#allocation7 + $0xf8] sm:$0xff] }
  0x56   :  { %322 = vst [vmem:[#allocation8 + $0xd8] sm:$0xff] %v273_v18  ;;  %v275_v28 = vadd.f32 %v226_v17, %v177_v19  ;;  %v179_v29 = vadd.f32 %v130_v26, %v81_v25  ;;  %v82_v30 = vld [vmem:[#allocation2 + $0x100] sm:$0xff]  ;;  %v131_v31 = vld [vmem:[#allocation5 + $0x100] sm:$0xff]  ;;  %v229_v32 = vld [vmem:[#allocation7 + $0x100] sm:$0xff] }
  0x57   :  { %323 = vst [vmem:[#allocation8 + $0xe0] sm:$0xff] %v274_v23  ;;  %v276_v33 = vadd.f32 %v227_v22, %v178_v24  ;;  %v180_v34 = vadd.f32 %v131_v31, %v82_v30  ;;  %v83_v35 = vld [vmem:[#allocation2 + $0x108] sm:$0xff]  ;;  %v132_v36 = vld [vmem:[#allocation5 + $0x108] sm:$0xff]  ;;  %v230_v37 = vld [vmem:[#allocation7 + $0x108] sm:$0xff] }
  0x58   :  { %324 = vst [vmem:[#allocation8 + $0xe8] sm:$0xff] %v275_v28  ;;  %v277_v38 = vadd.f32 %v228_v27, %v179_v29  ;;  %v181_v39 = vadd.f32 %v132_v36, %v83_v35  ;;  %v84_v40 = vld [vmem:[#allocation2 + $0x110] sm:$0xff]  ;;  %v133_v41 = vld [vmem:[#allocation5 + $0x110] sm:$0xff]  ;;  %v231_v42 = vld [vmem:[#allocation7 + $0x110] sm:$0xff] }
  0x59   :  { %325 = vst [vmem:[#allocation8 + $0xf0] sm:$0xff] %v276_v33  ;;  %v278_v43 = vadd.f32 %v229_v32, %v180_v34  ;;  %v182_v44 = vadd.f32 %v133_v41, %v84_v40  ;;  %v85_v45 = vld [vmem:[#allocation2 + $0x118] sm:$0xff]  ;;  %v134_v46 = vld [vmem:[#allocation5 + $0x118] sm:$0xff]  ;;  %v232_v47 = vld [vmem:[#allocation7 + $0x118] sm:$0xff] }
  0x5a   :  { %326 = vst [vmem:[#allocation8 + $0xf8] sm:$0xff] %v277_v38  ;;  %v279_v48 = vadd.f32 %v230_v37, %v181_v39  ;;  %v183_v49 = vadd.f32 %v134_v46, %v85_v45  ;;  %v86_v50 = vld [vmem:[#allocation2 + $0x120] sm:$0xff]  ;;  %v135_v51 = vld [vmem:[#allocation5 + $0x120] sm:$0xff]  ;;  %v233_v52 = vld [vmem:[#allocation7 + $0x120] sm:$0xff] }
  0x5b   :  { %327 = vst [vmem:[#allocation8 + $0x100] sm:$0xff] %v278_v43  ;;  %v280_v53 = vadd.f32 %v231_v42, %v182_v44  ;;  %v184_v54 = vadd.f32 %v135_v51, %v86_v50  ;;  %v87_v55 = vld [vmem:[#allocation2 + $0x128] sm:$0xff]  ;;  %v136_v56 = vld [vmem:[#allocation5 + $0x128] sm:$0xff]  ;;  %v234_v57 = vld [vmem:[#allocation7 + $0x128] sm:$0xff] }
  0x5c   :  { %328 = vst [vmem:[#allocation8 + $0x108] sm:$0xff] %v279_v48  ;;  %v281_v58 = vadd.f32 %v232_v47, %v183_v49  ;;  %v185_v59 = vadd.f32 %v136_v56, %v87_v55  ;;  %v88_v60 = vld [vmem:[#allocation2 + $0x130] sm:$0xff]  ;;  %v137_v61 = vld [vmem:[#allocation5 + $0x130] sm:$0xff]  ;;  %v235_v62 = vld [vmem:[#allocation7 + $0x130] sm:$0xff] }
  0x5d   :  { %329 = vst [vmem:[#allocation8 + $0x110] sm:$0xff] %v280_v53  ;;  %v282_v63 = vadd.f32 %v233_v52, %v184_v54  ;;  %v186_v0 = vadd.f32 %v137_v61, %v88_v60  ;;  %v89_v1 = vld [vmem:[#allocation2 + $0x138] sm:$0xff]  ;;  %v138_v2 = vld [vmem:[#allocation5 + $0x138] sm:$0xff]  ;;  %v236_v3 = vld [vmem:[#allocation7 + $0x138] sm:$0xff] }
  0x5e   :  { %330 = vst [vmem:[#allocation8 + $0x118] sm:$0xff] %v281_v58  ;;  %v283_v4 = vadd.f32 %v234_v57, %v185_v59  ;;  %v187_v5 = vadd.f32 %v138_v2, %v89_v1  ;;  %v90_v6 = vld [vmem:[#allocation2 + $0x140] sm:$0xff]  ;;  %v139_v7 = vld [vmem:[#allocation5 + $0x140] sm:$0xff]  ;;  %v237_v8 = vld [vmem:[#allocation7 + $0x140] sm:$0xff] }
  0x5f   :  { %331 = vst [vmem:[#allocation8 + $0x120] sm:$0xff] %v282_v63  ;;  %v284_v9 = vadd.f32 %v235_v62, %v186_v0  ;;  %v188_v10 = vadd.f32 %v139_v7, %v90_v6  ;;  %v91_v11 = vld [vmem:[#allocation2 + $0x148] sm:$0xff]  ;;  %v140_v12 = vld [vmem:[#allocation5 + $0x148] sm:$0xff]  ;;  %v238_v13 = vld [vmem:[#allocation7 + $0x148] sm:$0xff] }
  0x60   :  { %332 = vst [vmem:[#allocation8 + $0x128] sm:$0xff] %v283_v4  ;;  %v285_v14 = vadd.f32 %v236_v3, %v187_v5  ;;  %v189_v15 = vadd.f32 %v140_v12, %v91_v11  ;;  %v92_v16 = vld [vmem:[#allocation2 + $0x150] sm:$0xff]  ;;  %v141_v17 = vld [vmem:[#allocation5 + $0x150] sm:$0xff]  ;;  %v239_v18 = vld [vmem:[#allocation7 + $0x150] sm:$0xff] }
  0x61   :  { %333 = vst [vmem:[#allocation8 + $0x130] sm:$0xff] %v284_v9  ;;  %v286_v19 = vadd.f32 %v237_v8, %v188_v10  ;;  %v190_v20 = vadd.f32 %v141_v17, %v92_v16  ;;  %v93_v21 = vld [vmem:[#allocation2 + $0x158] sm:$0xff]  ;;  %v142_v22 = vld [vmem:[#allocation5 + $0x158] sm:$0xff]  ;;  %v240_v23 = vld [vmem:[#allocation7 + $0x158] sm:$0xff] }
  0x62   :  { %334 = vst [vmem:[#allocation8 + $0x138] sm:$0xff] %v285_v14  ;;  %v287_v24 = vadd.f32 %v238_v13, %v189_v15  ;;  %v191_v25 = vadd.f32 %v142_v22, %v93_v21  ;;  %v94_v26 = vld [vmem:[#allocation2 + $0x160] sm:$0xff]  ;;  %v143_v27 = vld [vmem:[#allocation5 + $0x160] sm:$0xff]  ;;  %v241_v28 = vld [vmem:[#allocation7 + $0x160] sm:$0xff] }
  0x63   :  { %335 = vst [vmem:[#allocation8 + $0x140] sm:$0xff] %v286_v19  ;;  %v288_v29 = vadd.f32 %v239_v18, %v190_v20  ;;  %v192_v30 = vadd.f32 %v143_v27, %v94_v26  ;;  %v95_v31 = vld [vmem:[#allocation2 + $0x168] sm:$0xff]  ;;  %v144_v32 = vld [vmem:[#allocation5 + $0x168] sm:$0xff]  ;;  %v242_v33 = vld [vmem:[#allocation7 + $0x168] sm:$0xff] }
  0x64   :  { %336 = vst [vmem:[#allocation8 + $0x148] sm:$0xff] %v287_v24  ;;  %v289_v34 = vadd.f32 %v240_v23, %v191_v25  ;;  %v193_v35 = vadd.f32 %v144_v32, %v95_v31  ;;  %v96_v36 = vld [vmem:[#allocation2 + $0x170] sm:$0xff]  ;;  %v145_v37 = vld [vmem:[#allocation5 + $0x170] sm:$0xff]  ;;  %v243_v38 = vld [vmem:[#allocation7 + $0x170] sm:$0xff] }
  0x65   :  { %337 = vst [vmem:[#allocation8 + $0x150] sm:$0xff] %v288_v29  ;;  %v290_v39 = vadd.f32 %v241_v28, %v192_v30  ;;  %v194_v40 = vadd.f32 %v145_v37, %v96_v36  ;;  %v97_v41 = vld [vmem:[#allocation2 + $0x178] sm:$0xff]  ;;  %v146_v42 = vld [vmem:[#allocation5 + $0x178] sm:$0xff]  ;;  %v244_v43 = vld [vmem:[#allocation7 + $0x178] sm:$0xff] }
  0x66   :  { %338 = vst [vmem:[#allocation8 + $0x158] sm:$0xff] %v289_v34  ;;  %v291_v44 = vadd.f32 %v242_v33, %v193_v35  ;;  %v195_v45 = vadd.f32 %v146_v42, %v97_v41  ;;  %v98_v46 = vld [vmem:[#allocation2 + $0x180] sm:$0xff]  ;;  %v147_v47 = vld [vmem:[#allocation5 + $0x180] sm:$0xff]  ;;  %v245_v48 = vld [vmem:[#allocation7 + $0x180] sm:$0xff] }
  0x67   :  { %339 = vst [vmem:[#allocation8 + $0x160] sm:$0xff] %v290_v39  ;;  %v292_v49 = vadd.f32 %v243_v38, %v194_v40  ;;  %v196_v50 = vadd.f32 %v147_v47, %v98_v46 }
  0x68   :  { %340 = vst [vmem:[#allocation8 + $0x168] sm:$0xff] %v291_v44  ;;  %v293_v51 = vadd.f32 %v244_v43, %v195_v45 }
  0x69   :  { %341 = vst [vmem:[#allocation8 + $0x170] sm:$0xff] %v292_v49  ;;  %v294_v52 = vadd.f32 %v245_v48, %v196_v50 }
  0x6a   :  { %342 = vst [vmem:[#allocation8 + $0x178] sm:$0xff] %v293_v51 }
  0x6b   :  { %343 = vst [vmem:[#allocation8 + $0x180] sm:$0xff] %v294_v52 }
  0x6c   :  { %441 = shalt.err (!%p438_p0)
}
  0x6d   :  { %s442_s23 = scalar_lea.hbm %s533_s3, 6272 }
  0x6e   :  { %p443_p1 = scmp.ne.s32.totalorder %s533_s3, %s442_s23  ;;  %p446_p2 = scmp.lt.u32.totalorder %s442_s23, %s533_s3 }
  0x70   :  { %p448_p3 = pnand %p446_p2, %p443_p1 }
  0x72   :  { %451 = shalt.err (!%p448_p3)
}
  0x73   :  { %353 = dma.vmem_to_hbm [thread:$0]  %s351_s19, 6272, %s533_s3, [#allocation4]  }
  0x74   :  { %456 = dma.done.wait [#allocation4], 6272  }
  0x75   :  { %457 = vsyncadd [#allocation4], 4294961024 }
  0x76   :  { %357 = vsyncpa [#allocation3], 1 }
  0x77   :  { %358 = vsyncpa [#allocation6], 1 }
  0x78   :  { %359 = vsyncpa [#allocation4], 1 }

</bundles_post_ra>
